<compile_context>
chip_gen: v6e
topology: v6e:2x2x1
jax: 0.10.0
libtpu: 0.0.40
codegen_flags: <defaults>
</compile_context>

<pallas_src>
import functools

import jax
import jax.numpy as jnp
from jax import lax
from jax.experimental import pallas as pl
from jax.experimental.pallas import tpu as pltpu

EPS = 1e-5  # torch.nn.LayerNorm default


def _round_up(x, m):
    return (x + m - 1) // m * m


def _cdiv(a, b):
    return -(-a // b)


def _sublane(dtype):
    # minimal second-to-last tile for this dtype (f32: 8, bf16: 16, int8: 32)
    return max(8, 32 // jnp.dtype(dtype).itemsize)


def _num_row_shards():
    # v7x has 2 TensorCores per chip; the row axis is the only "parallel" grid
    # dimension (the N axis must stay "arbitrary" for the LN scratch reuse), so
    # make sure it has >= 2 blocks there.  Harmless heuristic elsewhere.
    try:
        kind = getattr(jax.devices()[0], "device_kind", "") or ""
    except Exception:
        kind = ""
    return 2 if "7" in kind else 1


def _ln_rows_f32(x_f32, d_true):
    """Normalize rows of x_f32[..., Dp]; lanes >= d_true are zero padding."""
    dp = x_f32.shape[-1]
    if d_true < dp:
        col = lax.broadcasted_iota(jnp.int32, x_f32.shape, x_f32.ndim - 1)
        mask = col < d_true
        xm = jnp.where(mask, x_f32, 0.0)
        mean = jnp.sum(xm, axis=-1, keepdims=True) * (1.0 / d_true)
        cen = jnp.where(mask, x_f32 - mean, 0.0)
    else:
        mean = jnp.mean(x_f32, axis=-1, keepdims=True)
        cen = x_f32 - mean
    var = jnp.sum(cen * cen, axis=-1, keepdims=True) * (1.0 / d_true)  # biased, like torch
    return cen * lax.rsqrt(var + EPS)


# ---------------------- fused LayerNorm + Linear kernel ----------------------
def _prenorm_linear_kernel(x_ref, g_ref, b_ref, w_ref, bias_ref, o_ref, y_ref, *, d_true):
    # grid = (row_blocks, n_blocks); n is innermost, so the normalized row block
    # is computed once (j == 0) and reused for every output-column tile.
    j = pl.program_id(1)

    def _emit(y_operand):
        acc = jnp.dot(y_operand, w_ref[...], preferred_element_type=jnp.float32)
        o_ref[...] = (acc + bias_ref[...].astype(jnp.float32)).astype(o_ref.dtype)

    @pl.when(j == 0)
    def _():
        x = x_ref[...].astype(jnp.float32)
        xhat = _ln_rows_f32(x, d_true)
        y = xhat * g_ref[...].astype(jnp.float32) + b_ref[...].astype(jnp.float32)
        y_lo = y.astype(y_ref.dtype)   # padded lanes stay exactly 0 (gamma/beta padded w/ 0)
        y_ref[...] = y_lo              # cache for j > 0
        _emit(y_lo)                    # feed the MXU directly; no store->load round-trip

    @pl.when(j != 0)
    def _():
        _emit(y_ref[...])


def _choose_tiles(rows, dp, dp_out, x_bytes, y_bytes, out_bytes, sub,
                  tile_rows, tile_n, vmem_budget, min_row_blocks):
    # N tile: multiple of 128 dividing dp_out (dp_out is padded to 256-multiples
    # when > 128, so 256 always divides).
    tn = min(max(tile_n, 128), dp_out)
    tn = (tn // 128) * 128
    while dp_out % tn:
        tn -= 128

    if tile_rows is None:
        tile_rows = 1024 if y_bytes <= 2 else 512  # bf16 MXU operands -> bigger rows
    tr = min(_round_up(tile_rows, sub), _round_up(rows, sub))
    if min_row_blocks > 1 and rows > sub:
        tr = min(tr, _round_up(_cdiv(rows, min_row_blocks), sub))
    tr = max(sub, tr)

    def vmem_bytes(tr_, tn_):
        return (2 * tr_ * dp * x_bytes        # x row block (double-buffered)
                + tr_ * dp * y_bytes          # cached LN(x) scratch
                + 2 * dp * tn_ * y_bytes      # weight N-tile (double-buffered)
                + 2 * tr_ * tn_ * out_bytes   # output tile (double-buffered)
                + 2 * tn_ * 4 + 4 * dp * 4)   # bias / gamma / beta

    while tr > sub and vmem_bytes(tr, tn) > vmem_budget:
        tr = max(sub, _round_up(tr // 2, sub))
    while tn > 128 and vmem_bytes(tr, tn) > vmem_budget:
        tn -= 128
        while dp_out % tn:
            tn -= 128
    # TODO(synk): if even (sub, 128) tiles overflow the budget (very large D on
    # v7x), switch to a two-pass-stats + K-tiled matmul variant.
    return tr, tn


def make_prenorm_linear(gamma, beta, w, bias, *, mxu_dtype=None, tile_rows=None,
                        tile_n=256, vmem_budget_bytes=36 * 1024 * 1024):
    """Pre-pads / casts parameters ONCE and returns apply(x) -> fn(LayerNorm(x)).

    mxu_dtype: dtype fed to the MXU (weights + normalized activations).  Default
    keeps the parameter dtype; pass jnp.bfloat16 for f32 inputs to trade a bit of
    GEMM-operand precision for much higher MXU rate / lower VMEM pressure.
    """
    D, D_out = w.shape
    assert gamma.shape == (D,) and beta.shape == (D,) and bias.shape == (D_out,)

    Dp = _round_up(D, 128)
    # 256-wide N padding fills the 2x256^2 MXU on v6e/v7x; keep 128 for tiny D_out.
    Dp_out = 128 if D_out <= 128 else _round_up(D_out, 256)
    mxu_dt = jnp.dtype(mxu_dtype) if mxu_dtype is not None else jnp.dtype(w.dtype)

    # ---- parameter padding hoisted out of the per-call hot path ----
    gp = gamma if D == Dp else jnp.pad(gamma, (0, Dp - D))
    bp = beta if D == Dp else jnp.pad(beta, (0, Dp - D))
    gp = gp.astype(jnp.float32).reshape(1, Dp)
    bp = bp.astype(jnp.float32).reshape(1, Dp)
    wp = w if (D == Dp and D_out == Dp_out) else jnp.pad(w, ((0, Dp - D), (0, Dp_out - D_out)))
    wp = wp.astype(mxu_dt)
    biasp = bias if D_out == Dp_out else jnp.pad(bias, (0, Dp_out - D_out))
    biasp = biasp.astype(jnp.float32).reshape(1, Dp_out)

    min_row_blocks = _num_row_shards()
    kernel = functools.partial(_prenorm_linear_kernel, d_true=D)

    def apply(x):
        assert x.shape[-1] == D
        lead = x.shape[:-1]
        rows = 1
        for s in lead:
            rows *= int(s)
        x2 = x.reshape(rows, D)

        x_bytes = jnp.dtype(x.dtype).itemsize
        sub = _sublane(x.dtype)
        tr, tn = _choose_tiles(rows, Dp, Dp_out, x_bytes, mxu_dt.itemsize, x_bytes,
                               sub, tile_rows, tile_n, vmem_budget_bytes, min_row_blocks)
        rows_p = _round_up(rows, tr)

        xp = x2 if (rows_p == rows and Dp == D) else jnp.pad(
            x2, ((0, rows_p - rows), (0, Dp - D)))

        cost = pl.CostEstimate(
            flops=2 * rows * D * D_out,
            transcendentals=rows,  # one rsqrt per row
            bytes_accessed=(rows * D * x_bytes
                            + int(wp.size) * mxu_dt.itemsize
                            + rows * D_out * x_bytes),
        )

        out = pl.pallas_call(
            kernel,
            out_shape=jax.ShapeDtypeStruct((rows_p, Dp_out), x.dtype),
            grid_spec=pltpu.PrefetchScalarGridSpec(
                num_scalar_prefetch=0,
                grid=(rows_p // tr, Dp_out // tn),
                in_specs=[
                    pl.BlockSpec((tr, Dp), lambda i, j: (i, 0)),   # x rows
                    pl.BlockSpec((1, Dp), lambda i, j: (0, 0)),    # gamma (resident)
                    pl.BlockSpec((1, Dp), lambda i, j: (0, 0)),    # beta  (resident)
                    pl.BlockSpec((Dp, tn), lambda i, j: (0, j)),   # weight N-tile
                    pl.BlockSpec((1, tn), lambda i, j: (0, j)),    # bias  N-tile
                ],
                out_specs=pl.BlockSpec((tr, tn), lambda i, j: (i, j)),
                scratch_shapes=[pltpu.VMEM((tr, Dp), mxu_dt)],     # cached LN(x) row block
            ),
            compiler_params=pltpu.CompilerParams(
                dimension_semantics=("parallel", "arbitrary"),
                vmem_limit_bytes=int(min(vmem_budget_bytes + (12 << 20), 56 << 20)),
            ),
            cost_estimate=cost,
        )(xp, gp, bp, wp, biasp)

        return out[:rows, :D_out].reshape(lead + (D_out,))

    return apply


def prenorm_linear(x, gamma, beta, w, bias, **kwargs):
    """One-shot convenience wrapper (pads params per call; prefer make_prenorm_linear)."""
    return make_prenorm_linear(gamma, beta, w, bias, **kwargs)(x)


# ----------------- standalone LayerNorm (generic-`fn` path) ------------------
def _layernorm_kernel(x_ref, g_ref, b_ref, o_ref, *, d_true):
    x = x_ref[...].astype(jnp.float32)
    xhat = _ln_rows_f32(x, d_true)
    y = xhat * g_ref[...].astype(jnp.float32) + b_ref[...].astype(jnp.float32)
    o_ref[...] = y.astype(o_ref.dtype)


def layernorm(x, gamma, beta, *, vmem_budget_bytes=12 * 1024 * 1024):
    """Pallas LayerNorm over the last axis of x[..., D].  Purely HBM-bound; the
    row tile is sized from a byte budget (2 in + 2 out double-buffered blocks)."""
    orig_shape = x.shape
    D = orig_shape[-1]
    x2 = x.reshape(-1, D)
    rows = x2.shape[0]

    Dp = _round_up(D, 128)
    sub = _sublane(x.dtype)
    bytes_per_row = Dp * jnp.dtype(x.dtype).itemsize
    tr = max(sub, min(1024, vmem_budget_bytes // (4 * bytes_per_row)))
    tr = max(sub, (tr // sub) * sub)
    tr = min(tr, _round_up(rows, sub))
    rows_p = _round_up(rows, tr)

    xp = x2 if (rows_p == rows and Dp == D) else jnp.pad(
        x2, ((0, rows_p - rows), (0, Dp - D)))
    gp = (gamma if D == Dp else jnp.pad(gamma, (0, Dp - D))).astype(jnp.float32).reshape(1, Dp)
    bp = (beta if D == Dp else jnp.pad(beta, (0, Dp - D))).astype(jnp.float32).reshape(1, Dp)

    kernel = functools.partial(_layernorm_kernel, d_true=D)

    out = pl.pallas_call(
        kernel,
        out_shape=jax.ShapeDtypeStruct((rows_p, Dp), x.dtype),
        grid_spec=pltpu.PrefetchScalarGridSpec(
            num_scalar_prefetch=0,
            grid=(rows_p // tr,),
            in_specs=[
                pl.BlockSpec((tr, Dp), lambda i: (i, 0)),
                pl.BlockSpec((1, Dp), lambda i: (0, 0)),
                pl.BlockSpec((1, Dp), lambda i: (0, 0)),
            ],
            out_specs=pl.BlockSpec((tr, Dp), lambda i: (i, 0)),
        ),
        compiler_params=pltpu.CompilerParams(
            dimension_semantics=("parallel",),
            vmem_limit_bytes=32 * 1024 * 1024,
        ),
    )(xp, gp, bp)

    return out[:rows, :D].reshape(orig_shape)


def prenorm_forward(x, gamma, beta, fn, **kwargs):
    """Generic PreNorm: fn(LayerNorm(x), **kwargs) with fn an arbitrary callable."""
    return fn(layernorm(x, gamma, beta), **kwargs)


if __name__ == "__main__":
    B, S, D = 2, 8, 32
    key = jax.random.PRNGKey(0)
    kx, kw, kb = jax.random.split(key, 3)

    x = jax.random.normal(kx, (B, S, D), dtype=jnp.float32)

    # nn.LayerNorm(dim) default init: weight=1, bias=0
    gamma = jnp.ones((D,), dtype=jnp.float32)
    beta = jnp.zeros((D,), dtype=jnp.float32)

    # fn: deterministic Linear(dim, dim)
    w_fn = jax.random.normal(kw, (D, D), dtype=jnp.float32) * 0.02
    b_fn = jax.random.normal(kb, (D,), dtype=jnp.float32) * 0.02

    # fused LN + Linear (main Pallas path); params padded once at "init"
    prenorm = make_prenorm_linear(gamma, beta, w_fn, b_fn)
    out = prenorm(x)
    jax.block_until_ready(out)

    # standalone Pallas LayerNorm (generic-fn path) sanity check
    ln_out = layernorm(x, gamma, beta)
    jax.block_until_ready(ln_out)

    # pure-JAX reference
    mean = jnp.mean(x, axis=-1, keepdims=True)
    var = jnp.mean((x - mean) ** 2, axis=-1, keepdims=True)
    ref_ln = (x - mean) / jnp.sqrt(var + EPS) * gamma + beta
    ref = ref_ln @ w_fn + b_fn

    assert out.shape == (B, S, D)
    assert jnp.allclose(out, ref, atol=1e-4, rtol=1e-4), "fused PreNorm mismatch vs reference"
    assert jnp.allclose(ln_out, ref_ln, atol=1e-4, rtol=1e-4), "LayerNorm mismatch vs reference"

    print("KERNEL_OK")
</pallas_src>

<mosaic_0001>
module attributes {stable_mosaic.version = 11 : i64} {
  func.func @_prenorm_linear_kernel(%arg0: i32, %arg1: i32, %arg2: memref<16x128xf32, #tpu.memory_space<vmem>>, %arg3: memref<1x128xf32, #tpu.memory_space<vmem>>, %arg4: memref<1x128xf32, #tpu.memory_space<vmem>>, %arg5: memref<128x128xf32, #tpu.memory_space<vmem>>, %arg6: memref<1x128xf32, #tpu.memory_space<vmem>>, %arg7: memref<16x128xf32, #tpu.memory_space<vmem>>, %arg8: memref<16x128xf32, #tpu.memory_space<vmem>>) attributes {dimension_semantics = [#tpu.dimension_semantics<parallel>, #tpu.dimension_semantics<arbitrary>], iteration_bounds = array<i64: 1, 1>, scalar_prefetch = 0 : i64, scratch_operands = 1 : i64, tpu.core_type = #tpu.core_type<tc>, window_params = [{transform_indices = @transform_0, window_bounds = array<i64: 16, 128>}, {pipeline_mode = #tpu.pipeline_mode<synchronous>, transform_indices = @transform_1, window_bounds = array<i64: 1, 128>}, {pipeline_mode = #tpu.pipeline_mode<synchronous>, transform_indices = @transform_2, window_bounds = array<i64: 1, 128>}, {transform_indices = @transform_3, window_bounds = array<i64: 128, 128>}, {transform_indices = @transform_4, window_bounds = array<i64: 1, 128>}, {transform_indices = @transform_5, window_bounds = array<i64: 16, 128>}]} {
    %c0_i32 = arith.constant 0 : i32
    %0 = arith.cmpi eq, %arg1, %c0_i32 : i32
    %1 = arith.extui %0 : i1 to i32
    %c0_i32_0 = arith.constant 0 : i32
    %2 = arith.cmpi ne, %1, %c0_i32_0 : i32
    scf.if %2 {
      %c0 = arith.constant 0 : index
      %c0_3 = arith.constant 0 : index
      %6 = vector.load %arg2[%c0, %c0_3] : memref<16x128xf32, #tpu.memory_space<vmem>>, vector<16x128xf32>
      %7 = tpu.iota {dimensions = array<i32: 1>} : vector<16x128xi32>
      %c32_i32 = arith.constant 32 : i32
      %8 = vector.broadcast %c32_i32 : i32 to vector<16x128xi32>
      %9 = arith.cmpi slt, %7, %8 : vector<16x128xi32>
      %cst = arith.constant 0.000000e+00 : f32
      %10 = vector.broadcast %cst : f32 to vector<16x128xf32>
      %11 = arith.select %9, %6, %10 : vector<16x128xi1>, vector<16x128xf32>
      %cst_4 = arith.constant dense<0.000000e+00> : vector<16xf32>
      %12 = vector.multi_reduction <add>, %11, %cst_4 [1] : vector<16x128xf32> to vector<16xf32>
      %13 = vector.shape_cast %12 : vector<16xf32> to vector<16x1xf32>
      %cst_5 = arith.constant 3.125000e-02 : f32
      %14 = vector.broadcast %cst_5 : f32 to vector<16x1xf32>
      %15 = arith.mulf %13, %14 : vector<16x1xf32>
      %16 = vector.broadcast %15 : vector<16x1xf32> to vector<16x128xf32>
      %17 = arith.subf %6, %16 : vector<16x128xf32>
      %cst_6 = arith.constant 0.000000e+00 : f32
      %18 = vector.broadcast %cst_6 : f32 to vector<16x128xf32>
      %19 = arith.select %9, %17, %18 : vector<16x128xi1>, vector<16x128xf32>
      %20 = arith.mulf %19, %19 : vector<16x128xf32>
      %cst_7 = arith.constant dense<0.000000e+00> : vector<16xf32>
      %21 = vector.multi_reduction <add>, %20, %cst_7 [1] : vector<16x128xf32> to vector<16xf32>
      %22 = vector.shape_cast %21 : vector<16xf32> to vector<16x1xf32>
      %cst_8 = arith.constant 3.125000e-02 : f32
      %23 = vector.broadcast %cst_8 : f32 to vector<16x1xf32>
      %24 = arith.mulf %22, %23 : vector<16x1xf32>
      %cst_9 = arith.constant 9.99999974E-6 : f32
      %25 = vector.broadcast %cst_9 : f32 to vector<16x1xf32>
      %26 = arith.addf %24, %25 : vector<16x1xf32>
      %27 = math.rsqrt %26 : vector<16x1xf32>
      %28 = vector.broadcast %27 : vector<16x1xf32> to vector<16x128xf32>
      %29 = arith.mulf %19, %28 : vector<16x128xf32>
      %c0_10 = arith.constant 0 : index
      %c0_11 = arith.constant 0 : index
      %30 = vector.load %arg3[%c0_10, %c0_11] : memref<1x128xf32, #tpu.memory_space<vmem>>, vector<1x128xf32>
      %31 = vector.broadcast %30 : vector<1x128xf32> to vector<16x128xf32>
      %32 = arith.mulf %29, %31 : vector<16x128xf32>
      %c0_12 = arith.constant 0 : index
      %c0_13 = arith.constant 0 : index
      %33 = vector.load %arg4[%c0_12, %c0_13] : memref<1x128xf32, #tpu.memory_space<vmem>>, vector<1x128xf32>
      %34 = vector.broadcast %33 : vector<1x128xf32> to vector<16x128xf32>
      %35 = arith.addf %32, %34 : vector<16x128xf32>
      %c0_14 = arith.constant 0 : index
      %c0_15 = arith.constant 0 : index
      %36 = vector.load %arg8[%c0_14, %c0_15] : memref<16x128xf32, #tpu.memory_space<vmem>>, vector<16x128xf32>
      tpu.vector_store %arg8[%c0_14, %c0_15], %35 {strides = array<i32>} : memref<16x128xf32, #tpu.memory_space<vmem>>, vector<16x128xf32>,
      %c0_16 = arith.constant 0 : index
      %c0_17 = arith.constant 0 : index
      %37 = vector.load %arg5[%c0_16, %c0_17] : memref<128x128xf32, #tpu.memory_space<vmem>>, vector<128x128xf32>
      %cst_18 = arith.constant dense<0.000000e+00> : vector<16x128xf32>
      %38 = tpu.matmul %35, %37, %cst_18 {dimension_numbers = #tpu.dot_dimension_numbers<[1], [0], [0], [1], [0, 0, 1, 1], [], []>} : vector<16x128xf32>, vector<128x128xf32>, vector<16x128xf32> -> vector<16x128xf32>
      %c0_19 = arith.constant 0 : index
      %c0_20 = arith.constant 0 : index
      %39 = vector.load %arg6[%c0_19, %c0_20] : memref<1x128xf32, #tpu.memory_space<vmem>>, vector<1x128xf32>
      %40 = vector.broadcast %39 : vector<1x128xf32> to vector<16x128xf32>
      %41 = arith.addf %38, %40 : vector<16x128xf32>
      %c0_21 = arith.constant 0 : index
      %c0_22 = arith.constant 0 : index
      %42 = vector.load %arg7[%c0_21, %c0_22] : memref<16x128xf32, #tpu.memory_space<vmem>>, vector<16x128xf32>
      tpu.vector_store %arg7[%c0_21, %c0_22], %41 {strides = array<i32>} : memref<16x128xf32, #tpu.memory_space<vmem>>, vector<16x128xf32>,
    } else {
    }
    %c0_i32_1 = arith.constant 0 : i32
    %3 = arith.cmpi ne, %arg1, %c0_i32_1 : i32
    %4 = arith.extui %3 : i1 to i32
    %c0_i32_2 = arith.constant 0 : i32
    %5 = arith.cmpi ne, %4, %c0_i32_2 : i32
    scf.if %5 {
      %c0 = arith.constant 0 : index
      %c0_3 = arith.constant 0 : index
      %6 = vector.load %arg8[%c0, %c0_3] : memref<16x128xf32, #tpu.memory_space<vmem>>, vector<16x128xf32>
      %c0_4 = arith.constant 0 : index
      %c0_5 = arith.constant 0 : index
      %7 = vector.load %arg5[%c0_4, %c0_5] : memref<128x128xf32, #tpu.memory_space<vmem>>, vector<128x128xf32>
      %cst = arith.constant dense<0.000000e+00> : vector<16x128xf32>
      %8 = tpu.matmul %6, %7, %cst {dimension_numbers = #tpu.dot_dimension_numbers<[1], [0], [0], [1], [0, 0, 1, 1], [], []>} : vector<16x128xf32>, vector<128x128xf32>, vector<16x128xf32> -> vector<16x128xf32>
      %c0_6 = arith.constant 0 : index
      %c0_7 = arith.constant 0 : index
      %9 = vector.load %arg6[%c0_6, %c0_7] : memref<1x128xf32, #tpu.memory_space<vmem>>, vector<1x128xf32>
      %10 = vector.broadcast %9 : vector<1x128xf32> to vector<16x128xf32>
      %11 = arith.addf %8, %10 : vector<16x128xf32>
      %c0_8 = arith.constant 0 : index
      %c0_9 = arith.constant 0 : index
      %12 = vector.load %arg7[%c0_8, %c0_9] : memref<16x128xf32, #tpu.memory_space<vmem>>, vector<16x128xf32>
      tpu.vector_store %arg7[%c0_8, %c0_9], %11 {strides = array<i32>} : memref<16x128xf32, #tpu.memory_space<vmem>>, vector<16x128xf32>,
    } else {
    }
    return
  }
  func.func @transform_0(%arg0: i32, %arg1: i32) -> (i32, i32) {
    %c0_i32 = arith.constant 0 : i32
    %c0_i32_0 = arith.constant 0 : i32
    return %arg0, %c0_i32 : i32, i32
  }
  func.func @transform_1(%arg0: i32, %arg1: i32) -> (i32, i32) {
    %c0_i32 = arith.constant 0 : i32
    %c0_i32_0 = arith.constant 0 : i32
    %c0_i32_1 = arith.constant 0 : i32
    return %c0_i32, %c0_i32_0 : i32, i32
  }
  func.func @transform_2(%arg0: i32, %arg1: i32) -> (i32, i32) {
    %c0_i32 = arith.constant 0 : i32
    %c0_i32_0 = arith.constant 0 : i32
    %c0_i32_1 = arith.constant 0 : i32
    return %c0_i32, %c0_i32_0 : i32, i32
  }
  func.func @transform_3(%arg0: i32, %arg1: i32) -> (i32, i32) {
    %c0_i32 = arith.constant 0 : i32
    %c0_i32_0 = arith.constant 0 : i32
    return %c0_i32, %arg1 : i32, i32
  }
  func.func @transform_4(%arg0: i32, %arg1: i32) -> (i32, i32) {
    %c0_i32 = arith.constant 0 : i32
    %c0_i32_0 = arith.constant 0 : i32
    return %c0_i32, %arg1 : i32, i32
  }
  func.func @transform_5(%arg0: i32, %arg1: i32) -> (i32, i32) {
    %c0_i32 = arith.constant 0 : i32
    return %arg0, %arg1 : i32, i32
  }
}

</mosaic_0001>

<bundles_post_ra>
// kernel: tpu_custom_call.1
= control target key start
LH: loop header
LB: loop body
LE: loop exit
PB: predicated region body
PF: predicated region fallthrough
CT: control target
= control target key end

     0   :  { %10 = vsyncpa [#allocation4], 0  ;;  %s526_s0 = inlined_call_operand.hbm [shape: f32[16,128], index: 0, kind: input, shape index: {}]   ;;  %s527_s1 = inlined_call_operand.vmem [shape: f32[1,128], index: 1, kind: input, shape index: {}]   ;;  %s528_s2 = inlined_call_operand.vmem [shape: f32[1,128], index: 2, kind: input, shape index: {}]   ;;  %s529_s3 = inlined_call_operand.hbm [shape: f32[128,128], index: 3, kind: input, shape index: {}]   ;;  %s530_s4 = inlined_call_operand.vmem [shape: f32[1,128], index: 4, kind: input, shape index: {}]   ;;  %s531_s5 = inlined_call_operand.hbm [shape: f32[16,128], index: 5, kind: output, shape index: {}]  }
   0x1   :  { %11 = vsyncpa [#allocation7], 0 }
   0x2   :  { %12 = vsyncpa [#allocation5], 0  ;;  %s460_s18 = smov [#allocation3]  }
   0x3   :  { %s18_s19 = sshll.u32 %s460_s18, 4  ;;  %s19_s19 = int_to_ptr.vmem [resolvable:$true] %s18_s19 }
   0x4   :  { %s402_s20 = scalar_lea.vmem %s19_s19, 256  ;;  %p407_p1 = scmp.lt.s32.totalorder %s19_s19, %s19_s19 }
   0x5   :  { %p403_p0 = scmp.ne.s32.totalorder %s19_s19, %s402_s20  ;;  %p408_p2 = scmp.lt.s32.totalorder %s402_s20, %s402_s20 }
   0x7   :  { %p409_p3 = por %p408_p2, %p407_p1 }
   0x9   :  { %p410_p4 = pnand %p409_p3, %p403_p0 }
   0xb   :  { %413 = shalt.err (!%p410_p4)
}
   0xc   :  { %s461_s21 = smov 128   ;;  %s462_s22 = smov 8  }
   0xd   :  { %24 = dma.hbm_to_vmem [thread:$0]  %s526_s0, 256, %s19_s19, [#allocation4], %s461_s21, %s461_s21, %s462_s22  }
   0xe   :  { %s463_s25 = smov [#allocation6]  }
   0xf   :  { %s34_s26 = sshll.u32 %s463_s25, 4  ;;  %s35_s26 = int_to_ptr.vmem [resolvable:$true] %s34_s26 }
  0x10   :  { %s422_s27 = scalar_lea.vmem %s35_s26, 2048  ;;  %p427_p6 = scmp.lt.s32.totalorder %s35_s26, %s35_s26 }
  0x11   :  { %p423_p5 = scmp.ne.s32.totalorder %s35_s26, %s422_s27  ;;  %p428_p7 = scmp.lt.s32.totalorder %s422_s27, %s422_s27 }
  0x13   :  { %p429_p8 = por %p428_p7, %p427_p6 }
  0x15   :  { %p430_p9 = pnand %p429_p8, %p423_p5 }
  0x17   :  { %433 = shalt.err (!%p430_p9)
}
  0x18   :  { %40 = dma.hbm_to_vmem [thread:$0]  %s529_s3, 2048, %s35_s26, [#allocation7], %s461_s21, %s461_s21, %s462_s22  }
  0x19   :  { %454 = dma.done.wait [#allocation4], 256  }
  0x1a   :  { %455 = vsyncadd [#allocation4], 4294967040 }
  0x1b   :  { %456 = dma.done.wait [#allocation7], 2048  }
  0x1c   :  { %457 = vsyncadd [#allocation7], 4294965248  ;;  %v55_v0 = vlaneseq  ;;  %v53_v2 = vld [vmem:[#allocation3] sm:$0xff]  ;;  %v54_v3 = vld [vmem:[#allocation3 + $0x8] sm:$0xff]  ;;  %s464_s9 = smov [#allocation8]  }
  0x1d   :  { %v119_v6 = vld [vmem:[#allocation6 + $0x78] sm:$0xff]  ;;  %v118_v7 = vld [vmem:[#allocation6 + $0x70] sm:$0xff]  ;;  %v117_v18 = vld [vmem:[#allocation6 + $0x68] sm:$0xff] }
  0x1e   :  { %v56_v1 = vand.u32 127, %v55_v0  ;;  %350 = vmatprep.subr.mxu0 %v119_v6  ;;  %v116_v19 = vld [vmem:[#allocation6 + $0x60] sm:$0xff]  ;;  %v115_v20 = vld [vmem:[#allocation6 + $0x58] sm:$0xff]  ;;  %v114_v21 = vld [vmem:[#allocation6 + $0x50] sm:$0xff] }
  0x1f   :  { %351 = vmatpush3.msra.mxu0 %v119_v6  ;;  %v113_v22 = vld [vmem:[#allocation6 + $0x48] sm:$0xff]  ;;  %v112_v23 = vld [vmem:[#allocation6 + $0x40] sm:$0xff]  ;;  %v111_v24 = vld [vmem:[#allocation6 + $0x38] sm:$0xff] }
  0x20   :  { %vm57_vm0 = vcmp.lt.s32.totalorder %v56_v1, 32  ;;  %352 = vmatprep.subr.mxu0 %v118_v7  ;;  %v110_v25 = vld [vmem:[#allocation6 + $0x30] sm:$0xff]  ;;  %v109_v26 = vld [vmem:[#allocation6 + $0x28] sm:$0xff]  ;;  %v108_v27 = vld [vmem:[#allocation6 + $0x20] sm:$0xff] }
  0x21   :  { %v58_v4 = vsel %vm57_vm0, %v53_v2, 0.0  ;;  %v59_v5 = vsel %vm57_vm0, %v54_v3, 0.0  ;;  %353 = vmatpush3.msra.mxu0 %v118_v7  ;;  %v107_v28 = vld [vmem:[#allocation6 + $0x18] sm:$0xff]  ;;  %v106_v29 = vld [vmem:[#allocation6 + $0x10] sm:$0xff]  ;;  %v105_v30 = vld [vmem:[#allocation6 + $0x8] sm:$0xff] }
  0x22   :  { %60 = vadd.xlane.f32.xlu0 %v58_v4  ;;  %354 = vmatprep.subr.mxu0 %v117_v18  ;;  %v104_v31 = vld [vmem:[#allocation6] sm:$0xff]  ;;  %v328_v39 = vld [vmem:[%s527_s1] ss:$0 sm:$0xff]  ;;  %s315_s1 = sshll.u32 %s464_s9, 4  ;;  %s316_s1 = int_to_ptr.vmem [resolvable:$true] %s315_s1 }
  0x23   :  { %355 = vmatpush3.msra.mxu0 %v117_v18  ;;  %v329_v41 = vld [vmem:[%s528_s2] ss:$0 sm:$0xff]  ;;  %s434_s2 = scalar_lea.vmem %s316_s1, 256  ;;  %p439_p11 = scmp.lt.s32.totalorder %s316_s1, %s316_s1 }
  0x24   :  { %356 = vmatprep.subr.mxu0 %v116_v19  ;;  %v330_v48 = vld [vmem:[%s530_s4] ss:$0 sm:$0xff]  ;;  %p435_p10 = scmp.ne.s32.totalorder %s316_s1, %s434_s2  ;;  %p440_p12 = scmp.lt.s32.totalorder %s434_s2, %s434_s2 }
  0x25   :  { %357 = vmatpush3.msra.mxu0 %v116_v19 }
  0x26   :  { %62 = vadd.xlane.f32.xlu0 %v59_v5  ;;  %358 = vmatprep.subr.mxu0 %v115_v20  ;;  %p441_p13 = por %p440_p12, %p439_p11 }
  0x27   :  { %359 = vmatpush3.msra.mxu0 %v115_v20 }
  0x28   :  { %360 = vmatprep.subr.mxu0 %v114_v21  ;;  %p442_p0 = pnand %p441_p13, %p435_p10 }
  0x29   :  { %361 = vmatpush3.msra.mxu0 %v114_v21 }
  0x2a   :  { %362 = vmatprep.subr.mxu0 %v113_v22 }
  0x2b   :  { %363 = vmatpush3.msra.mxu0 %v113_v22 }
  0x2c   :  { %364 = vmatprep.subr.mxu0 %v112_v23 }
  0x2d   :  { %365 = vmatpush3.msra.mxu0 %v112_v23 }
  0x2e   :  { %366 = vmatprep.subr.mxu0 %v111_v24 }
  0x2f   :  { %367 = vmatpush3.msra.mxu0 %v111_v24 }
  0x30   :  { %368 = vmatprep.subr.mxu0 %v110_v25 }
  0x31   :  { %369 = vmatpush3.msra.mxu0 %v110_v25 }
  0x32   :  { %370 = vmatprep.subr.mxu0 %v109_v26 }
  0x33   :  { %371 = vmatpush3.msra.mxu0 %v109_v26 }
  0x34   :  { %372 = vmatprep.subr.mxu0 %v108_v27 }
  0x35   :  { %373 = vmatpush3.msra.mxu0 %v108_v27 }
  0x36   :  { %374 = vmatprep.subr.mxu0 %v107_v28 }
  0x37   :  { %375 = vmatpush3.msra.mxu0 %v107_v28 }
  0x38   :  { %376 = vmatprep.subr.mxu0 %v106_v29 }
  0x39   :  { %377 = vmatpush3.msra.mxu0 %v106_v29 }
  0x3a   :  { %378 = vmatprep.subr.mxu0 %v105_v30 }
  0x3b   :  { %379 = vmatpush3.msra.mxu0 %v105_v30 }
  0x3c   :  { %380 = vmatprep.subr.mxu0 %v104_v31 }
  0x3d   :  { %381 = vmatpush3.msra.mxu0 %v104_v31 }
  0xab   :  { %v61_v8 = vpop.xlane.xlu0 %60 }
  0xac   :  { %v64_v9 = vmul.f32 0.03125, %v61_v8 }
  0xae   :  { %v66_v10 = vsub.f32 %v53_v2, %v64_v9 }
  0xaf   :  { %v63_v11 = vpop.xlane.xlu0 %62 }
  0xb0   :  { %v65_v12 = vmul.f32 0.03125, %v63_v11  ;;  %v68_v13 = vsel %vm57_vm0, %v66_v10, 0.0 }
  0xb1   :  { %v70_v14 = vmul.f32 %v68_v13, %v68_v13 }
  0xb2   :  { %v67_v15 = vsub.f32 %v54_v3, %v65_v12 }
  0xb3   :  { %72 = vadd.xlane.f32.xlu1 %v70_v14 }
  0xb4   :  { %v69_v16 = vsel %vm57_vm0, %v67_v15, 0.0 }
  0xb5   :  { %v71_v17 = vmul.f32 %v69_v16, %v69_v16 }
  0xb7   :  { %74 = vadd.xlane.f32.xlu1 %v71_v17 }
 0x13c   :  { %v73_v32 = vpop.xlane.xlu1 %72 }
 0x13d   :  { %v76_v33 = vmul.f32 0.03125, %v73_v32 }
 0x13f   :  { %v78_v34 = vadd.f32 1e-05, %v76_v33 }
 0x140   :  { %v75_v35 = vpop.xlane.xlu1 %74 }
 0x141   :  { %390 = vrsqrt.f32 %v78_v34  ;;  %v77_v36 = vmul.f32 0.03125, %v75_v35 }
 0x143   :  { %v79_v37 = vadd.f32 1e-05, %v77_v36 }
 0x145   :  { %392 = vrsqrt.f32 %v79_v37 }
 0x14e   :  { %v391_v38 = vpop.eup %390 }
 0x14f   :  { %v82_v40 = vmul.f32 %v391_v38, %v68_v13 }
 0x151   :  { %v91_v42 = vmul.f32 %v328_v39, %v82_v40 }
 0x152   :  { %v393_v43 = vpop.eup %392 }
 0x153   :  { %v83_v44 = vmul.f32 %v393_v43, %v69_v16  ;;  %v100_v45 = vadd.f32 %v329_v41, %v91_v42 }
 0x155   :  { %v92_v46 = vmul.f32 %v328_v39, %v83_v44  ;;  %382 = vmatprep.mubr.f32.mxu0 %v100_v45 }
 0x157   :  { %v101_v47 = vadd.f32 %v329_v41, %v92_v46 }
 0x159   :  { %383 = vmatmul.mubr.f32.vlgmr.msra.gmra.mxu0 %v101_v47 }
 0x219   :  { %v384_v49 = vpop.f32.mrf.mxu0 }
 0x21a   :  { %v199_v50 = vadd.f32 %v384_v49, %v330_v48 }
 0x21b   :  { %v193_v51 = vpop.f32.mrf.mxu0 }
 0x21c   :  { %203 = vst [vmem:[#allocation8 + $0x8] sm:$0xff] %v199_v50  ;;  %v194_v52 = vadd.f32 %v330_v48, %v193_v51 }
 0x21e   :  { %202 = vst [vmem:[#allocation8] sm:$0xff] %v194_v52 }
 0x21f   :  { %445 = shalt.err (!%p442_p0)
}
 0x220   :  { %321 = dma.vmem_to_hbm [thread:$0]  %s316_s1, 256, %s531_s5, [#allocation5], %s461_s21, %s461_s21, %s462_s22  }
 0x221   :  { %458 = dma.done.wait [#allocation5], 256  }
 0x222   :  { %459 = vsyncadd [#allocation5], 4294967040 }
 0x223   :  { %325 = vsyncpa [#allocation4], 1 }
 0x224   :  { %326 = vsyncpa [#allocation7], 1 }
 0x225   :  { %327 = vsyncpa [#allocation5], 1 }

</bundles_post_ra>
